<compile_context>
chip_gen: v7x
topology: tpu7x:2x2x1
jax: 0.10.0
libtpu: 0.0.40
codegen_flags: <defaults>
</compile_context>

<pallas_src>
import jax
import jax.numpy as jnp
import numpy as np
from jax.experimental import pallas as pl
from jax.experimental.pallas import tpu as pltpu


# ------------------------- fused kernel -------------------------

def fused_hete_gnn_kernel(a_ref, w_ref, x_ref, w1_ref, b1_ref, w2t_ref,
                          wp_ref, bp_ref, o_ref, z_sc, s_sc):
    # a_ref : (L, N, N) bf16   adjacency chain of THIS metapath (identity-padded)
    # w_ref : (1, F, H) f32    GCN weight of THIS metapath
    # x_ref : (N, F)    f32    node features (resident across grid, fetched once)
    # w1_ref/b1_ref/w2t_ref    semantic-attention params (H,128)/(1,128)/(1,128)
    # wp_ref/bp_ref            predict Linear params (H,OUT)/(1,OUT)
    # o_ref : (N, OUT)  f32    final softmax output (written at last step only)
    # z_sc  : (M, N, H) f32    per-metapath embeddings (VMEM scratch)
    # s_sc  : (M, 1)    f32    per-metapath attention scores (VMEM scratch)
    m = pl.program_id(0)
    L, N, _ = a_ref.shape
    M = z_sc.shape[0]

    # ---- metapath adjacency composition: P = A_e0 @ A_e1 @ ... ----
    # Path counts are small non-negative integers; since mx only keeps the
    # 0 / >0 structure (clip at 1), bf16 operands give the exact structure.
    p = a_ref[0].astype(jnp.float32)
    for l in range(1, L):
        p = jnp.dot(p.astype(jnp.bfloat16), a_ref[l],
                    preferred_element_type=jnp.float32)

    # ---- mx = clip(P + I, max=1), built inline on the resident P ----
    row = jax.lax.broadcasted_iota(jnp.int32, (N, N), 0)
    col = jax.lax.broadcasted_iota(jnp.int32, (N, N), 1)
    mx = jnp.where(row == col, 1.0, jnp.minimum(p, 1.0))

    # ---- DGL DenseGraphConv(norm='both', bias=False, activation=relu) ----
    deg = jnp.sum(mx, axis=1, keepdims=True)                       # (N, 1)  XLU
    norm = jax.lax.rsqrt(jnp.maximum(deg, 1.0))                    # D^{-1/2} EUP
    xw = jnp.dot(x_ref[...], w_ref[0],
                 preferred_element_type=jnp.float32)               # (N, H)  MXU
    # (X * norm) @ W == norm * (X @ W): scale the smaller (N, H) tensor instead.
    rst = jnp.dot(mx.astype(jnp.bfloat16), (xw * norm).astype(jnp.bfloat16),
                  preferred_element_type=jnp.float32)              # (N, H)  MXU
    rst = jnp.maximum(rst * norm, 0.0)                             # relu
    # F.normalize(dim=1): rst * rsqrt(max(||rst||^2, eps))  (EUP rsqrt, no div)
    inv_l2 = jax.lax.rsqrt(
        jnp.maximum(jnp.sum(rst * rst, axis=1, keepdims=True), 1e-24))
    z = rst * inv_l2                                               # (N, H)

    # stash per-metapath embedding + semantic-attention score in VMEM scratch
    z_sc[pl.ds(m, 1)] = z[None]
    h = jnp.tanh(jnp.dot(z, w1_ref[...], preferred_element_type=jnp.float32)
                 + b1_ref[...])                                    # (N, 128) EUP
    s_sc[pl.ds(m, 1)] = jnp.sum(h * w2t_ref[...], keepdims=True) * (1.0 / N)

    # ---- final step: semantic attention softmax + predict + softmax ----
    # TODO(synk): the cross-metapath softmax fused here forces "arbitrary" grid
    # semantics; for v7x 2-TC sharding split into a parallel per-metapath kernel
    # plus a tiny attention/predict kernel.
    @pl.when(m == pl.num_programs(0) - 1)
    def _finalize():
        scores = s_sc[...]                                         # (M, 1)
        smax = scores[0:1, :]
        for mm in range(1, M):
            smax = jnp.maximum(smax, scores[mm:mm + 1, :])
        exps = [jnp.exp(scores[mm:mm + 1, :] - smax) for mm in range(M)]
        den = exps[0]
        for mm in range(1, M):
            den = den + exps[mm]
        inv_den = pl.reciprocal(den, approx=True)                  # (1, 1) EUP
        fused = (exps[0] * inv_den) * z_sc[0]
        for mm in range(1, M):
            fused = fused + (exps[mm] * inv_den) * z_sc[mm]        # (N, H)

        z2 = jnp.dot(fused, wp_ref[...], preferred_element_type=jnp.float32) \
             + bp_ref[...] + 1e-8
        z2 = z2 - jnp.max(z2, axis=1, keepdims=True)
        ez = jnp.exp(z2)
        o_ref[...] = ez * pl.reciprocal(jnp.sum(ez, axis=1, keepdims=True),
                                        approx=True)


# ------------------------- wrapper -------------------------

def hete_gnn_forward(A_list, X, gcn_weights, w1, b1, w2, wp, bp, meta_paths):
    M = len(meta_paths)
    N, F = X.shape
    H = gcn_weights[0].shape[1]
    OUT = wp.shape[1]
    L = max(len(mp) for mp in meta_paths)

    # Stack per-metapath adjacency chains (identity-padded so every chain has
    # length L; P @ I == P) and per-metapath GCN weights.  bf16 adjacency keeps
    # the exact 0 / >0 reachability structure.
    eye = jnp.eye(N, dtype=jnp.float32)
    mats = []
    for mp in meta_paths:
        mats.extend([A_list[e] for e in mp] + [eye] * (L - len(mp)))
    A_stack = jnp.stack(mats).astype(jnp.bfloat16)         # (M*L, N, N)
    W_stack = jnp.stack(gcn_weights)                        # (M, F, H)
    w2t = jnp.transpose(w2)                                 # (1, ATTN_HID)

    grid_spec = pltpu.PrefetchScalarGridSpec(
        num_scalar_prefetch=0,
        grid=(M,),
        in_specs=[
            pl.BlockSpec((L, N, N), lambda m: (m, 0, 0)),        # this metapath's chain
            pl.BlockSpec((1, F, H), lambda m: (m, 0, 0)),        # this metapath's W
            pl.BlockSpec((N, F), lambda m: (0, 0)),              # X (resident)
            pl.BlockSpec(w1.shape, lambda m: (0, 0)),
            pl.BlockSpec(b1.shape, lambda m: (0, 0)),
            pl.BlockSpec(w2t.shape, lambda m: (0, 0)),
            pl.BlockSpec(wp.shape, lambda m: (0, 0)),
            pl.BlockSpec(bp.shape, lambda m: (0, 0)),
        ],
        out_specs=pl.BlockSpec((N, OUT), lambda m: (0, 0)),       # resident, written last
        scratch_shapes=[
            pltpu.VMEM((M, N, H), jnp.float32),                   # Z stack
            pltpu.VMEM((M, 1), jnp.float32),                      # attention scores
        ],
    )
    return pl.pallas_call(
        fused_hete_gnn_kernel,
        out_shape=jax.ShapeDtypeStruct((N, OUT), jnp.float32),
        grid_spec=grid_spec,
        compiler_params=pltpu.CompilerParams(
            dimension_semantics=("arbitrary",)),   # metapath axis carries scratch state
    )(A_stack, W_stack, X, w1, b1, w2t, wp, bp)
    # TODO(synk): the `check=True` path (dgl.metapath_reachable_graph sanity
    # assert) has no Pallas equivalent; `return_reachable_adj` could be
    # supported by also emitting the composed mx matrices as extra outputs.
    # TODO(synk): for large N the (N,N) composition should be tiled over an
    # extra grid axis; at this spec size the whole graph fits in one VMEM tile.


# ------------------------- pure-JAX reference (for verification) -------------------------

def reference_forward(A_list, X, gcn_weights, w1, b1, w2, wp, bp, meta_paths):
    N = X.shape[0]
    z_list = []
    for i, mp in enumerate(meta_paths):
        P = A_list[mp[0]]
        for e in mp[1:]:
            P = P @ A_list[e]
        mx = jnp.minimum(P + jnp.eye(N, dtype=jnp.float32), 1.0)
        deg = jnp.sum(mx, axis=1, keepdims=True)
        norm = 1.0 / jnp.sqrt(jnp.maximum(deg, 1.0))
        rst = (mx @ ((X * norm) @ gcn_weights[i])) * norm
        rst = jnp.maximum(rst, 0.0)
        l2 = jnp.sqrt(jnp.sum(rst * rst, axis=1, keepdims=True))
        z_list.append(rst / jnp.maximum(l2, 1e-12))
    Z = jnp.stack(z_list, axis=1)                 # (N, M, H) — torch layout
    proj = jnp.tanh(Z @ w1 + b1) @ w2             # (N, M, 1)
    w_mean = jnp.mean(proj, axis=0)               # (M, 1)
    beta = jax.nn.softmax(w_mean, axis=0)         # (M, 1)
    fused = jnp.sum(beta[None] * Z, axis=1)       # (N, H)
    z2 = fused @ wp + bp + 1e-8
    return jax.nn.softmax(z2, axis=1)


# ------------------------- main -------------------------

if __name__ == "__main__":
    N, F, HID, OUT = 64, 32, 8, 4        # nodes, in_size, hidden_size, out_size
    ATTN_HID = 128                        # SemanticAttention hidden size
    meta_paths = [(0, 1), (2, 3)]         # two meta-paths, each of two edge types
    M = len(meta_paths)
    n_etypes = 4

    key = jax.random.PRNGKey(0)
    keys = jax.random.split(key, 16)

    # random binary adjacency matrices per edge type
    A_list = [(jax.random.uniform(keys[e], (N, N)) < 0.1).astype(jnp.float32)
              for e in range(n_etypes)]
    X = jax.random.normal(keys[4], (N, F), dtype=jnp.float32)

    # deterministic parameter init (synthetic; shapes from __init__)
    gcn_weights = [jax.random.normal(keys[5 + i], (F, HID), dtype=jnp.float32)
                   * (1.0 / np.sqrt(F)) for i in range(M)]
    w1 = jax.random.normal(keys[8], (HID, ATTN_HID), dtype=jnp.float32) * (1.0 / np.sqrt(HID))
    b1 = jax.random.normal(keys[9], (1, ATTN_HID), dtype=jnp.float32) * 0.1
    w2 = jax.random.normal(keys[10], (ATTN_HID, 1), dtype=jnp.float32) * (1.0 / np.sqrt(ATTN_HID))
    wp = jax.random.normal(keys[11], (HID, OUT), dtype=jnp.float32) * (1.0 / np.sqrt(HID))
    bp = jax.random.normal(keys[12], (1, OUT), dtype=jnp.float32) * 0.1

    out = hete_gnn_forward(A_list, X, gcn_weights, w1, b1, w2, wp, bp, meta_paths)
    out = jax.block_until_ready(out)

    ref = reference_forward(A_list, X, gcn_weights, w1, b1, w2, wp, bp, meta_paths)
    ref = jax.block_until_ready(ref)

    np.testing.assert_allclose(np.asarray(out), np.asarray(ref), rtol=1e-2, atol=1e-2)
    print("KERNEL_OK")
</pallas_src>

<mosaic_0001>
module attributes {stable_mosaic.version = 11 : i64} {
  func.func @fused_hete_gnn_kernel(%arg0: i32, %arg1: memref<2x64x64xbf16, #tpu.memory_space<vmem>>, %arg2: memref<1x32x8xf32, #tpu.memory_space<vmem>>, %arg3: memref<64x32xf32, #tpu.memory_space<vmem>>, %arg4: memref<8x128xf32, #tpu.memory_space<vmem>>, %arg5: memref<1x128xf32, #tpu.memory_space<vmem>>, %arg6: memref<1x128xf32, #tpu.memory_space<vmem>>, %arg7: memref<8x4xf32, #tpu.memory_space<vmem>>, %arg8: memref<1x4xf32, #tpu.memory_space<vmem>>, %arg9: memref<64x4xf32, #tpu.memory_space<vmem>>, %arg10: memref<2x64x8xf32, #tpu.memory_space<vmem>>, %arg11: memref<2x1xf32, #tpu.memory_space<vmem>>) attributes {dimension_semantics = [#tpu.dimension_semantics<arbitrary>], iteration_bounds = array<i64: 2>, scalar_prefetch = 0 : i64, scratch_operands = 2 : i64, tpu.core_type = #tpu.core_type<tc>, window_params = [{transform_indices = @transform_0, window_bounds = array<i64: 2, 64, 64>}, {transform_indices = @transform_1, window_bounds = array<i64: 1, 32, 8>}, {pipeline_mode = #tpu.pipeline_mode<synchronous>, transform_indices = @transform_2, window_bounds = array<i64: 64, 32>}, {pipeline_mode = #tpu.pipeline_mode<synchronous>, transform_indices = @transform_3, window_bounds = array<i64: 8, 128>}, {pipeline_mode = #tpu.pipeline_mode<synchronous>, transform_indices = @transform_4, window_bounds = array<i64: 1, 128>}, {pipeline_mode = #tpu.pipeline_mode<synchronous>, transform_indices = @transform_5, window_bounds = array<i64: 1, 128>}, {pipeline_mode = #tpu.pipeline_mode<synchronous>, transform_indices = @transform_6, window_bounds = array<i64: 8, 4>}, {pipeline_mode = #tpu.pipeline_mode<synchronous>, transform_indices = @transform_7, window_bounds = array<i64: 1, 4>}, {pipeline_mode = #tpu.pipeline_mode<synchronous>, transform_indices = @transform_8, window_bounds = array<i64: 64, 4>}]} {
    %c0 = arith.constant 0 : index
    %c0_0 = arith.constant 0 : index
    %c0_1 = arith.constant 0 : index
    %0 = vector.load %arg1[%c0, %c0_0, %c0_1] : memref<2x64x64xbf16, #tpu.memory_space<vmem>>, vector<1x64x64xbf16>
    %1 = vector.shape_cast %0 : vector<1x64x64xbf16> to vector<64x64xbf16>
    %2 = arith.extf %1 : vector<64x64xbf16> to vector<64x64xf32>
    %3 = arith.truncf %2 : vector<64x64xf32> to vector<64x64xbf16>
    %c1 = arith.constant 1 : index
    %c0_2 = arith.constant 0 : index
    %c0_3 = arith.constant 0 : index
    %4 = vector.load %arg1[%c1, %c0_2, %c0_3] : memref<2x64x64xbf16, #tpu.memory_space<vmem>>, vector<1x64x64xbf16>
    %5 = vector.shape_cast %4 : vector<1x64x64xbf16> to vector<64x64xbf16>
    %cst = arith.constant dense<0.000000e+00> : vector<64x64xf32>
    %6 = tpu.matmul %3, %5, %cst {dimension_numbers = #tpu.dot_dimension_numbers<[1], [0], [0], [1], [0, 0, 1, 1], [], []>} : vector<64x64xbf16>, vector<64x64xbf16>, vector<64x64xf32> -> vector<64x64xf32>
    %7 = tpu.iota {dimensions = array<i32: 0>} : vector<64x64xi32>
    %8 = tpu.iota {dimensions = array<i32: 1>} : vector<64x64xi32>
    %9 = arith.cmpi eq, %7, %8 : vector<64x64xi32>
    %cst_4 = arith.constant 1.000000e+00 : f32
    %10 = vector.broadcast %cst_4 : f32 to vector<64x64xf32>
    %11 = arith.minimumf %6, %10 : vector<64x64xf32>
    %cst_5 = arith.constant 1.000000e+00 : f32
    %12 = vector.broadcast %cst_5 : f32 to vector<64x64xf32>
    %13 = arith.select %9, %12, %11 : vector<64x64xi1>, vector<64x64xf32>
    %cst_6 = arith.constant dense<0.000000e+00> : vector<64xf32>
    %14 = vector.multi_reduction <add>, %13, %cst_6 [1] : vector<64x64xf32> to vector<64xf32>
    %15 = vector.shape_cast %14 : vector<64xf32> to vector<64x1xf32>
    %cst_7 = arith.constant 1.000000e+00 : f32
    %16 = vector.broadcast %cst_7 : f32 to vector<64x1xf32>
    %17 = arith.maximumf %15, %16 : vector<64x1xf32>
    %18 = math.rsqrt %17 : vector<64x1xf32>
    %c0_8 = arith.constant 0 : index
    %c0_9 = arith.constant 0 : index
    %19 = vector.load %arg3[%c0_8, %c0_9] : memref<64x32xf32, #tpu.memory_space<vmem>>, vector<64x32xf32>
    %c0_10 = arith.constant 0 : index
    %c0_11 = arith.constant 0 : index
    %c0_12 = arith.constant 0 : index
    %20 = vector.load %arg2[%c0_10, %c0_11, %c0_12] : memref<1x32x8xf32, #tpu.memory_space<vmem>>, vector<1x32x8xf32>
    %21 = vector.shape_cast %20 : vector<1x32x8xf32> to vector<32x8xf32>
    %cst_13 = arith.constant dense<0.000000e+00> : vector<64x8xf32>
    %22 = tpu.matmul %19, %21, %cst_13 {dimension_numbers = #tpu.dot_dimension_numbers<[1], [0], [0], [1], [0, 0, 1, 1], [], []>} : vector<64x32xf32>, vector<32x8xf32>, vector<64x8xf32> -> vector<64x8xf32>
    %23 = arith.truncf %13 : vector<64x64xf32> to vector<64x64xbf16>
    %24 = vector.broadcast %18 : vector<64x1xf32> to vector<64x8xf32>
    %25 = arith.mulf %22, %24 : vector<64x8xf32>
    %26 = arith.truncf %25 : vector<64x8xf32> to vector<64x8xbf16>
    %cst_14 = arith.constant dense<0.000000e+00> : vector<64x8xf32>
    %27 = tpu.matmul %23, %26, %cst_14 {dimension_numbers = #tpu.dot_dimension_numbers<[1], [0], [0], [1], [0, 0, 1, 1], [], []>} : vector<64x64xbf16>, vector<64x8xbf16>, vector<64x8xf32> -> vector<64x8xf32>
    %28 = vector.broadcast %18 : vector<64x1xf32> to vector<64x8xf32>
    %29 = arith.mulf %27, %28 : vector<64x8xf32>
    %cst_15 = arith.constant 0.000000e+00 : f32
    %30 = vector.broadcast %cst_15 : f32 to vector<64x8xf32>
    %31 = arith.maximumf %29, %30 : vector<64x8xf32>
    %32 = arith.mulf %31, %31 : vector<64x8xf32>
    %cst_16 = arith.constant dense<0.000000e+00> : vector<64xf32>
    %33 = vector.multi_reduction <add>, %32, %cst_16 [1] : vector<64x8xf32> to vector<64xf32>
    %34 = vector.shape_cast %33 : vector<64xf32> to vector<64x1xf32>
    %cst_17 = arith.constant 1.000000e-24 : f32
    %35 = vector.broadcast %cst_17 : f32 to vector<64x1xf32>
    %36 = arith.maximumf %34, %35 : vector<64x1xf32>
    %37 = math.rsqrt %36 : vector<64x1xf32>
    %38 = vector.broadcast %37 : vector<64x1xf32> to vector<64x8xf32>
    %39 = arith.mulf %31, %38 : vector<64x8xf32>
    %40 = vector.shape_cast %39 : vector<64x8xf32> to vector<1x64x8xf32>
    %41 = arith.index_cast %arg0 : i32 to index
    %c0_18 = arith.constant 0 : index
    %c0_19 = arith.constant 0 : index
    %42 = vector.load %arg10[%41, %c0_18, %c0_19] : memref<2x64x8xf32, #tpu.memory_space<vmem>>, vector<1x64x8xf32>
    tpu.vector_store %arg10[%41, %c0_18, %c0_19], %40 {strides = array<i32>} : memref<2x64x8xf32, #tpu.memory_space<vmem>>, vector<1x64x8xf32>,
    %c0_20 = arith.constant 0 : index
    %c0_21 = arith.constant 0 : index
    %43 = vector.load %arg4[%c0_20, %c0_21] : memref<8x128xf32, #tpu.memory_space<vmem>>, vector<8x128xf32>
    %cst_22 = arith.constant dense<0.000000e+00> : vector<64x128xf32>
    %44 = tpu.matmul %39, %43, %cst_22 {dimension_numbers = #tpu.dot_dimension_numbers<[1], [0], [0], [1], [0, 0, 1, 1], [], []>} : vector<64x8xf32>, vector<8x128xf32>, vector<64x128xf32> -> vector<64x128xf32>
    %c0_23 = arith.constant 0 : index
    %c0_24 = arith.constant 0 : index
    %45 = vector.load %arg5[%c0_23, %c0_24] : memref<1x128xf32, #tpu.memory_space<vmem>>, vector<1x128xf32>
    %46 = vector.broadcast %45 : vector<1x128xf32> to vector<64x128xf32>
    %47 = arith.addf %44, %46 : vector<64x128xf32>
    %48 = math.tanh %47 : vector<64x128xf32>
    %c0_25 = arith.constant 0 : index
    %c0_26 = arith.constant 0 : index
    %49 = vector.load %arg6[%c0_25, %c0_26] : memref<1x128xf32, #tpu.memory_space<vmem>>, vector<1x128xf32>
    %50 = vector.broadcast %49 : vector<1x128xf32> to vector<64x128xf32>
    %51 = arith.mulf %48, %50 : vector<64x128xf32>
    %52 = vector.shape_cast %51 : vector<64x128xf32> to vector<1x64x128xf32>
    %cst_27 = arith.constant dense<0.000000e+00> : vector<1xf32>
    %53 = vector.multi_reduction <add>, %52, %cst_27 [1, 2] : vector<1x64x128xf32> to vector<1xf32>
    %54 = vector.shape_cast %53 : vector<1xf32> to vector<1x1x1xf32>
    %55 = vector.extract %54[0, 0, 0] : f32 from vector<1x1x1xf32>
    %56 = vector.broadcast %55 : f32 to vector<1x1xf32>
    %cst_28 = arith.constant 1.562500e-02 : f32
    %57 = vector.broadcast %cst_28 : f32 to vector<1x1xf32>
    %58 = arith.mulf %56, %57 : vector<1x1xf32>
    %59 = arith.index_cast %arg0 : i32 to index
    %c0_29 = arith.constant 0 : index
    %60 = vector.load %arg11[%59, %c0_29] : memref<2x1xf32, #tpu.memory_space<vmem>>, vector<1x1xf32>
    tpu.vector_store %arg11[%59, %c0_29], %58 {strides = array<i32>} : memref<2x1xf32, #tpu.memory_space<vmem>>, vector<1x1xf32>,
    %c1_i32 = arith.constant 1 : i32
    %61 = arith.cmpi eq, %arg0, %c1_i32 : i32
    %62 = arith.extui %61 : i1 to i32
    %c0_i32 = arith.constant 0 : i32
    %63 = arith.cmpi ne, %62, %c0_i32 : i32
    scf.if %63 {
      %c0_30 = arith.constant 0 : index
      %c0_31 = arith.constant 0 : index
      %64 = vector.load %arg11[%c0_30, %c0_31] : memref<2x1xf32, #tpu.memory_space<vmem>>, vector<2x1xf32>
      %65 = vector.extract_strided_slice %64 {offsets = [0, 0], sizes = [1, 1], strides = [1, 1]} : vector<2x1xf32> to vector<1x1xf32>
      %66 = vector.extract_strided_slice %64 {offsets = [1, 0], sizes = [1, 1], strides = [1, 1]} : vector<2x1xf32> to vector<1x1xf32>
      %67 = arith.maximumf %65, %66 : vector<1x1xf32>
      %68 = vector.extract_strided_slice %64 {offsets = [0, 0], sizes = [1, 1], strides = [1, 1]} : vector<2x1xf32> to vector<1x1xf32>
      %69 = arith.subf %68, %67 : vector<1x1xf32>
      %70 = math.exp %69 : vector<1x1xf32>
      %71 = vector.extract_strided_slice %64 {offsets = [1, 0], sizes = [1, 1], strides = [1, 1]} : vector<2x1xf32> to vector<1x1xf32>
      %72 = arith.subf %71, %67 : vector<1x1xf32>
      %73 = math.exp %72 : vector<1x1xf32>
      %74 = arith.addf %70, %73 : vector<1x1xf32>
      %75 = tpu.reciprocal %74 {approx = true} : vector<1x1xf32> -> vector<1x1xf32>
      %76 = arith.mulf %70, %75 : vector<1x1xf32>
      %c0_32 = arith.constant 0 : index
      %c0_33 = arith.constant 0 : index
      %c0_34 = arith.constant 0 : index
      %77 = vector.load %arg10[%c0_32, %c0_33, %c0_34] : memref<2x64x8xf32, #tpu.memory_space<vmem>>, vector<1x64x8xf32>
      %78 = vector.shape_cast %77 : vector<1x64x8xf32> to vector<64x8xf32>
      %79 = vector.broadcast %76 : vector<1x1xf32> to vector<64x8xf32>
      %80 = arith.mulf %79, %78 : vector<64x8xf32>
      %81 = arith.mulf %73, %75 : vector<1x1xf32>
      %c1_35 = arith.constant 1 : index
      %c0_36 = arith.constant 0 : index
      %c0_37 = arith.constant 0 : index
      %82 = vector.load %arg10[%c1_35, %c0_36, %c0_37] : memref<2x64x8xf32, #tpu.memory_space<vmem>>, vector<1x64x8xf32>
      %83 = vector.shape_cast %82 : vector<1x64x8xf32> to vector<64x8xf32>
      %84 = vector.broadcast %81 : vector<1x1xf32> to vector<64x8xf32>
      %85 = arith.mulf %84, %83 : vector<64x8xf32>
      %86 = arith.addf %80, %85 : vector<64x8xf32>
      %c0_38 = arith.constant 0 : index
      %c0_39 = arith.constant 0 : index
      %87 = vector.load %arg7[%c0_38, %c0_39] : memref<8x4xf32, #tpu.memory_space<vmem>>, vector<8x4xf32>
      %cst_40 = arith.constant dense<0.000000e+00> : vector<64x4xf32>
      %88 = tpu.matmul %86, %87, %cst_40 {dimension_numbers = #tpu.dot_dimension_numbers<[1], [0], [0], [1], [0, 0, 1, 1], [], []>} : vector<64x8xf32>, vector<8x4xf32>, vector<64x4xf32> -> vector<64x4xf32>
      %c0_41 = arith.constant 0 : index
      %c0_42 = arith.constant 0 : index
      %89 = vector.load %arg8[%c0_41, %c0_42] : memref<1x4xf32, #tpu.memory_space<vmem>>, vector<1x4xf32>
      %90 = vector.broadcast %89 : vector<1x4xf32> to vector<64x4xf32>
      %91 = arith.addf %88, %90 : vector<64x4xf32>
      %cst_43 = arith.constant 9.99999993E-9 : f32
      %92 = vector.broadcast %cst_43 : f32 to vector<64x4xf32>
      %93 = arith.addf %91, %92 : vector<64x4xf32>
      %cst_44 = arith.constant dense<0xFF800000> : vector<64xf32>
      %94 = vector.multi_reduction <maximumf>, %93, %cst_44 [1] : vector<64x4xf32> to vector<64xf32>
      %95 = vector.shape_cast %94 : vector<64xf32> to vector<64x1xf32>
      %96 = vector.broadcast %95 : vector<64x1xf32> to vector<64x4xf32>
      %97 = arith.subf %93, %96 : vector<64x4xf32>
      %98 = math.exp %97 : vector<64x4xf32>
      %cst_45 = arith.constant dense<0.000000e+00> : vector<64xf32>
      %99 = vector.multi_reduction <add>, %98, %cst_45 [1] : vector<64x4xf32> to vector<64xf32>
      %100 = vector.shape_cast %99 : vector<64xf32> to vector<64x1xf32>
      %101 = tpu.reciprocal %100 {approx = true} : vector<64x1xf32> -> vector<64x1xf32>
      %102 = vector.broadcast %101 : vector<64x1xf32> to vector<64x4xf32>
      %103 = arith.mulf %98, %102 : vector<64x4xf32>
      %c0_46 = arith.constant 0 : index
      %c0_47 = arith.constant 0 : index
      %104 = vector.load %arg9[%c0_46, %c0_47] : memref<64x4xf32, #tpu.memory_space<vmem>>, vector<64x4xf32>
      tpu.vector_store %arg9[%c0_46, %c0_47], %103 {strides = array<i32>} : memref<64x4xf32, #tpu.memory_space<vmem>>, vector<64x4xf32>,
    } else {
    }
    return
  }
  func.func @transform_0(%arg0: i32) -> (i32, i32, i32) {
    %c0_i32 = arith.constant 0 : i32
    %c0_i32_0 = arith.constant 0 : i32
    %c0_i32_1 = arith.constant 0 : i32
    return %arg0, %c0_i32, %c0_i32_0 : i32, i32, i32
  }
  func.func @transform_1(%arg0: i32) -> (i32, i32, i32) {
    %c0_i32 = arith.constant 0 : i32
    %c0_i32_0 = arith.constant 0 : i32
    %c0_i32_1 = arith.constant 0 : i32
    return %arg0, %c0_i32, %c0_i32_0 : i32, i32, i32
  }
  func.func @transform_2(%arg0: i32) -> (i32, i32) {
    %c0_i32 = arith.constant 0 : i32
    %c0_i32_0 = arith.constant 0 : i32
    %c0_i32_1 = arith.constant 0 : i32
    return %c0_i32, %c0_i32_0 : i32, i32
  }
  func.func @transform_3(%arg0: i32) -> (i32, i32) {
    %c0_i32 = arith.constant 0 : i32
    %c0_i32_0 = arith.constant 0 : i32
    %c0_i32_1 = arith.constant 0 : i32
    return %c0_i32, %c0_i32_0 : i32, i32
  }
  func.func @transform_4(%arg0: i32) -> (i32, i32) {
    %c0_i32 = arith.constant 0 : i32
    %c0_i32_0 = arith.constant 0 : i32
    %c0_i32_1 = arith.constant 0 : i32
    return %c0_i32, %c0_i32_0 : i32, i32
  }
  func.func @transform_5(%arg0: i32) -> (i32, i32) {
    %c0_i32 = arith.constant 0 : i32
    %c0_i32_0 = arith.constant 0 : i32
    %c0_i32_1 = arith.constant 0 : i32
    return %c0_i32, %c0_i32_0 : i32, i32
  }
  func.func @transform_6(%arg0: i32) -> (i32, i32) {
    %c0_i32 = arith.constant 0 : i32
    %c0_i32_0 = arith.constant 0 : i32
    %c0_i32_1 = arith.constant 0 : i32
    return %c0_i32, %c0_i32_0 : i32, i32
  }
  func.func @transform_7(%arg0: i32) -> (i32, i32) {
    %c0_i32 = arith.constant 0 : i32
    %c0_i32_0 = arith.constant 0 : i32
    %c0_i32_1 = arith.constant 0 : i32
    return %c0_i32, %c0_i32_0 : i32, i32
  }
  func.func @transform_8(%arg0: i32) -> (i32, i32) {
    %c0_i32 = arith.constant 0 : i32
    %c0_i32_0 = arith.constant 0 : i32
    %c0_i32_1 = arith.constant 0 : i32
    return %c0_i32, %c0_i32_0 : i32, i32
  }
}

</mosaic_0001>

<bundles_post_ra>
// kernel: tpu_custom_call.1
= control target key start
LH: loop header
LB: loop body
LE: loop exit
PB: predicated region body
PF: predicated region fallthrough
CT: control target
= control target key end

     0   :  { %s1762_s27 = smov 0   ;;  %s2013_s0 = inlined_call_operand.vmem [shape: bf16[4,64,64], index: 0, kind: input, shape index: {}]   ;;  %s2014_s1 = inlined_call_operand.vmem [shape: f32[2,32,8], index: 1, kind: input, shape index: {}]   ;;  %s2015_s2 = inlined_call_operand.vmem [shape: f32[64,32], index: 2, kind: input, shape index: {}]   ;;  %s2016_s3 = inlined_call_operand.vmem [shape: f32[8,128], index: 3, kind: input, shape index: {}]   ;;  %s2017_s4 = inlined_call_operand.vmem [shape: f32[1,128], index: 4, kind: input, shape index: {}]   ;;  %s2018_s5 = inlined_call_operand.vmem [shape: f32[1,128], index: 5, kind: input, shape index: {}]   ;;  %s2019_s6 = inlined_call_operand.vmem [shape: f32[8,4], index: 6, kind: input, shape index: {}]   ;;  %s2020_s7 = inlined_call_operand.vmem [shape: f32[1,4], index: 7, kind: input, shape index: {}]   ;;  %s2021_s8 = inlined_call_operand.vmem [shape: f32[64,4], index: 8, kind: output, shape index: {}]  }
   0x1 LB: > { %s1768_s28 = sadd.s32 4294967295, %s1715_s27   ;;  %p1396_p0 = scmp.ge.s32.totalorder %s1715_s27, 1  ;;  %s1715_s27 = sphi %s1762_s27, %s18_s27  }
   0x2   : > { %p269_p1 = scmp.lt.s32.totalorder %s1715_s27, 3 }
   0x4   : > { %p270_p2 = pnand %p1396_p0, %p269_p1 }
   0x5   : > { %s1397_s29 = sshll.u32 (!%p270_p2), %s1768_s28, 1  ;;  %p311_p3 = scmp.lt.s32.totalorder (!%p270_p2), %s1768_s28, 1  ;;  %v531_v0 = vld [vmem:[%s2015_s2] sm:$0xff] (!%p270_p2)  ;;  %vm543_vm0 = vcmask (!%p270_p2), 261120   ;;  %vm378_vm1 = vcmask (!%p270_p2), 523264   ;;  %v532_v12 = vld [vmem:[%s2015_s2 + $0x8] sm:$0xff] (!%p270_p2)  ;;  %v456_v22 = vlaneseq (!%p270_p2) }
   0x6   : > { %273 = sbr.rel (%p270_p2) target bundleno = 1914 (0x77a), region = 52  ;;  %p305_p4 = scmp.lt.s32.totalorder (!%p270_p2), %s1397_s29, 3  ;;  %1533 = vmatprep.mubr.msk.f32.mxu1 (!%p270_p2), %vm543_vm0, %v531_v0  ;;  %v533_v13 = vld [vmem:[%s2015_s2 + $0x10] sm:$0xff] (!%p270_p2)  ;;  %v534_v16 = vld [vmem:[%s2015_s2 + $0x18] sm:$0xff] (!%p270_p2)  ;;  %v535_v17 = vld [vmem:[%s2015_s2 + $0x20] sm:$0xff] (!%p270_p2)  ;;  %vm790_vm10 = vcmask (!%p270_p2), 64512  }
   0x7   : > { %v536_v18 = vld [vmem:[%s2015_s2 + $0x28] sm:$0xff] (!%p270_p2)  ;;  %v537_v19 = vld [vmem:[%s2015_s2 + $0x30] sm:$0xff] (!%p270_p2)  ;;  %v538_v21 = vld [vmem:[%s2015_s2 + $0x38] sm:$0xff] (!%p270_p2)  ;;  %v457_v23 = vshrl.u32 (!%p270_p2), %v456_v22, 7  ;;  %v466_v24 = vand.u32 (!%p270_p2), 127, %v456_v22  ;;  %vm1028_vm11 = vcmask (!%p270_p2), 0  }
   0x8   : > { %s1460_s22 = scalar_lea.vmem (!%p270_p2), [#allocation3], %s1715_s27  ;;  %p1446_p5 = scmp.ne.s32.totalorder (!%p270_p2), %s1768_s28, 1 }
   0x9   : > { %v459_v25 = vadd.s32 (!%p270_p2), 16, %v457_v23  ;;  %v460_v26 = vadd.s32 (!%p270_p2), 24, %v457_v23  ;;  %v458_v27 = vadd.s32 (!%p270_p2), 8, %v457_v23  ;;  %vm467_vm3 = vcmp.eq.s32.totalorder (!%p270_p2), %v457_v23, %v466_v24 }
   0xa   : > { %v463_v39 = vadd.s32 (!%p270_p2), 48, %v457_v23  ;;  %v461_v42 = vadd.s32 (!%p270_p2), 32, %v457_v23  ;;  %v464_v45 = vadd.s32 (!%p270_p2), 56, %v457_v23  ;;  %v462_v47 = vadd.s32 (!%p270_p2), 40, %v457_v23 }
   0xb   : > { %vm469_vm2 = vcmp.eq.s32.totalorder (!%p270_p2), %v459_v25, %v466_v24  ;;  %vm470_vm4 = vcmp.eq.s32.totalorder (!%p270_p2), %v460_v26, %v466_v24  ;;  %vm468_vm5 = vcmp.eq.s32.totalorder (!%p270_p2), %v458_v27, %v466_v24 }
   0xc   : > { %vm473_vm6 = vcmp.eq.s32.totalorder (!%p270_p2), %v463_v39, %v466_v24  ;;  %vm471_vm7 = vcmp.eq.s32.totalorder (!%p270_p2), %v461_v42, %v466_v24  ;;  %vm474_vm8 = vcmp.eq.s32.totalorder (!%p270_p2), %v464_v45, %v466_v24  ;;  %vm472_vm9 = vcmp.eq.s32.totalorder (!%p270_p2), %v462_v47, %v466_v24 }
   0xd   : > { %s312_s10 = scalar_select %p311_p3, %s1768_s28, 1 }
   0xe   : > { %s2023_s29 = smov (!%p305_p4, %s1397_s29), 3  ;;  %vm1253_vm12 = vcmask (!%p1446_p5), 31744  }
   0xf   : > { %s1459_s11 = sshll.u32 %s312_s10, 5  ;;  %s1458_s12 = sshll.u32 %s2023_s29, 5 }
  0x10   : > { %s315_s15 = scalar_lea.vmem %s2014_s1, %s1459_s11  ;;  %s1785_s18 = scalar_lea.vmem %s2013_s0, %s1458_s12 }
  0x11   : > { %v539_v1 = vld [vmem:[%s315_s15] sm:$0xff]  ;;  %v540_v2 = vld [vmem:[%s315_s15 + $0x8] sm:$0xff]  ;;  %v1617_v6 = vld [vmem:[%s1785_s18 + $0x30] sm:$0xff]  }
  0x12   : > { %v1615_v3 = vld [vmem:[%s1785_s18 + $0x20] sm:$0xff]   ;;  %v1589_v4 = vpack.c.bf16 %v540_v2, %v539_v1  ;;  %v1616_v5 = vld [vmem:[%s1785_s18 + $0x28] sm:$0xff]   ;;  %v541_v8 = vld [vmem:[%s315_s15 + $0x10] sm:$0xff] }
  0x13   : > { %1509 = vmatprep.subr.bf16.mxu0 %v1615_v3  ;;  %v1619_v7 = vld [vmem:[%s1785_s18] sm:$0xff]   ;;  %v1618_v9 = vld [vmem:[%s1785_s18 + $0x38] sm:$0xff]   ;;  %v1620_v14 = vld [vmem:[%s1785_s18 + $0x8] sm:$0xff]  }
  0x14   : > { %1590 = vmatprep.subr.bf16.mxu1 %v1589_v4  ;;  %1510 = vmatpush3.bf16.msra.mxu0 %v1615_v3  ;;  %v542_v10 = vld [vmem:[%s315_s15 + $0x18] sm:$0xff]  ;;  %v1621_v15 = vld [vmem:[%s1785_s18 + $0x10] sm:$0xff]   ;;  %s1434_s15 = sshll.u32 %s1768_s28, 6 }
  0x15   : > { %1592 = vmatpush3.bf16.msra.mxu1 %v1589_v4  ;;  %1511 = vmatprep.subr.bf16.mxu0 %v1616_v5  ;;  %v1593_v11 = vpack.c.bf16 %v542_v10, %v541_v8  ;;  %v1622_v20 = vld [vmem:[%s1785_s18 + $0x18] sm:$0xff]   ;;  %s840_s16 = scalar_lea.vmem [#allocation2], %s1434_s15 }
  0x16   : > { %1517 = vmatprep.mubr.msk.bf16.mxu0 %vm378_vm1, %v1619_v7 }
  0x17   : > { %1594 = vmatprep.subr.bf16.mxu1 %v1593_v11 }
  0x18   : > { %1512 = vmatpush3.bf16.msra.mxu0 %v1616_v5 }
  0x19   : > { %1513 = vmatprep.subr.bf16.mxu0 %v1617_v6  ;;  %1596 = vmatpush3.bf16.msra.mxu1 %v1593_v11 }
  0x1c   : > { %1514 = vmatpush3.bf16.msra.mxu0 %v1617_v6  ;;  %1534 = vmatmul.mubr.msk.f32.vlgmr.msra.gmra.mrb[0].mxu1 %vm543_vm0, %v532_v12 }
  0x1d   : > { %1515 = vmatprep.subr.bf16.mxu0 %v1618_v9  ;;  %1536 = vmatprep.mubr.msk.f32.mxu1 %vm543_vm0, %v533_v13 }
  0x20   : > { %1516 = vmatpush3.bf16.msra.mxu0 %v1618_v9  ;;  %1537 = vmatmul.mubr.msk.f32.gmra.mrb[2].mxu1 %vm543_vm0, %v534_v16 }
  0x21   : > { %1539 = vmatprep.mubr.msk.f32.mxu1 %vm543_vm0, %v535_v17 }
  0x23   : > { %1518 = vmatmul.mubr.msk.bf16.vlgmr.msra.gmra.mrb[0].mxu0 %vm378_vm1, %v1620_v14 }
  0x24   : > { %1521 = vmatprep.mubr.msk.bf16.mxu0 %vm378_vm1, %v1621_v15  ;;  %1540 = vmatmul.mubr.msk.f32.gmra.mrb[4].mxu1 %vm543_vm0, %v536_v18 }
  0x25   : > { %1542 = vmatprep.mubr.msk.f32.mxu1 %vm543_vm0, %v537_v19 }
  0x28   : > { %1543 = vmatmul.mubr.msk.f32.gmra.mrb[6].mxu1 %vm543_vm0, %v538_v21 }
  0x2b   : > { %1522 = vmatmul.mubr.msk.bf16.gmra.mrb[4].mxu0 %vm378_vm1, %v1622_v20 }
  0xef   : > { %v1535_v4 = vpop.f32.mrb[0].mxu1 }
  0xf0   : > { %v634_v5 = vpop.f32.mrb[1].mxu1 }
  0xf3   : > { %v1538_v6 = vpop.f32.mrb[2].mxu1 }
  0xf4   : > { %v644_v7 = vpop.f32.mrb[3].mxu1 }
  0xf6   : > { %v1519_v28 = vpop.f32.mrb[0].mxu0 }
  0xf7   : > { %v477_v29 = vmin.f32 %v1519_v28, 1.0  ;;  %v425_v30 = vpop.f32.mrb[1].mxu0  ;;  %v1541_v8 = vpop.f32.mrb[4].mxu1 }
  0xf8   : > { %v475_v31 = vmin.f32 %v425_v30, 1.0  ;;  %v1520_v32 = vpop.f32.mrb[2].mxu0  ;;  %v654_v9 = vpop.f32.mrb[5].mxu1 }
  0xf9   : > { %v478_v33 = vmin.f32 %v1520_v32, 1.0  ;;  %v428_v34 = vpop.f32.mrb[3].mxu0  ;;  %v1827_v35 = vsel %vm469_vm2, 1.0, %v477_v29 }
  0xfa   : > { %v476_v36 = vmin.f32 %v428_v34, 1.0  ;;  %v497_v37 = vsel %vm378_vm1, %v1827_v35, 0.0  ;;  %v483_v38 = vsel %vm467_vm3, 1.0, %v475_v31 }
  0xfb   : > { %498 = vadd.xlane.f32.xlu1 %v497_v37  ;;  %v491_v40 = vsel %vm378_vm1, %v483_v38, 0.0  ;;  %v1832_v41 = vsel %vm470_vm4, 1.0, %v478_v33  ;;  %v1544_v10 = vpop.f32.mrb[6].mxu1 }
  0xfc   : > { %v484_v43 = vsel %vm468_vm5, 1.0, %v476_v36  ;;  %492 = vadd.xlane.f32.xlu0 %v491_v40  ;;  %v674_v44 = vpack.c.bf16 %v1832_v41, %v1827_v35  ;;  %v500_v49 = vsel %vm378_vm1, %v1832_v41, 0.0  ;;  %v664_v11 = vpop.f32.mrb[7].mxu1 }
  0xfd   : > { %v673_v46 = vpack.c.bf16 %v484_v43, %v483_v38  ;;  %v494_v52 = vsel %vm378_vm1, %v484_v43, 0.0 }
  0xfe   : > { %v1523_v48 = vpop.f32.mrb[4].mxu0 }
  0xff   : > { %v481_v50 = vmin.f32 %v1523_v48, 1.0  ;;  %501 = vadd.xlane.f32.xlu1 %v500_v49  ;;  %v441_v51 = vpop.f32.mrb[5].mxu0  ;;  %1553 = vmatprep.mubr.msk.bf16.mxu1 %vm378_vm1, %v673_v46 }
 0x100   : > { %v479_v53 = vmin.f32 %v441_v51, 1.0  ;;  %495 = vadd.xlane.f32.xlu0 %v494_v52  ;;  %v1524_v54 = vpop.f32.mrb[6].mxu0 }
 0x101   : > { %v482_v55 = vmin.f32 %v1524_v54, 1.0  ;;  %v444_v56 = vpop.f32.mrb[7].mxu0  ;;  %v1840_v57 = vsel %vm473_vm6, 1.0, %v481_v50 }
 0x102   : > { %v480_v58 = vmin.f32 %v444_v56, 1.0  ;;  %v1842_v59 = vsel %vm471_vm7, 1.0, %v479_v53  ;;  %v509_v2 = vsel %vm378_vm1, %v1840_v57, 0.0 }
 0x103   : > { %v503_v60 = vsel %vm378_vm1, %v1842_v59, 0.0  ;;  %v1846_v61 = vsel %vm474_vm8, 1.0, %v482_v55 }
 0x104   : > { %504 = vadd.xlane.f32.xlu0 %v503_v60  ;;  %v1848_v62 = vsel %vm472_vm9, 1.0, %v480_v58  ;;  %v676_v63 = vpack.c.bf16 %v1846_v61, %v1840_v57  ;;  %v512_v3 = vsel %vm378_vm1, %v1846_v61, 0.0 }
 0x105   : > { %v506_v0 = vsel %vm378_vm1, %v1848_v62, 0.0  ;;  %v675_v1 = vpack.c.bf16 %v1848_v62, %v1842_v59 }
 0x106   : > { %507 = vadd.xlane.f32.xlu1 %v506_v0 }
 0x108   : > { %510 = vadd.xlane.f32.xlu0 %v509_v2 }
 0x10a   : > { %513 = vadd.xlane.f32.xlu1 %v512_v3 }
 0x188   : > { %v499_v12 = vpop.xlane.xlu1 %498 }
 0x189   : > { %v517_v13 = vmax.f32 %v499_v12, 1.0  ;;  %v493_v14 = vpop.xlane.xlu0 %492 }
 0x18a   : > { %v515_v15 = vmax.f32 %v493_v14, 1.0 }
 0x18b   : > { %1623 = vrsqrt.f32 %v517_v13 }
 0x18c   : > { %v502_v16 = vpop.xlane.xlu1 %501  ;;  %1625 = vrsqrt.f32 %v515_v15 }
 0x18d   : > { %v518_v17 = vmax.f32 %v502_v16, 1.0  ;;  %v496_v18 = vpop.xlane.xlu0 %495 }
 0x18e   : > { %v516_v19 = vmax.f32 %v496_v18, 1.0 }
 0x18f   : > { %1627 = vrsqrt.f32 %v518_v17 }
 0x190   : > { %1629 = vrsqrt.f32 %v516_v19 }
 0x191   : > { %v505_v20 = vpop.xlane.xlu0 %504 }
 0x192   : > { %v519_v21 = vmax.f32 %v505_v20, 1.0 }
 0x193   : > { %v508_v22 = vpop.xlane.xlu1 %507 }
 0x194   : > { %1631 = vrsqrt.f32 %v519_v21  ;;  %v520_v23 = vmax.f32 %v508_v22, 1.0 }
 0x195   : > { %v511_v24 = vpop.xlane.xlu0 %510  ;;  %v1624_v26 = vpop.eup %1623 }
 0x196   : > { %1633 = vrsqrt.f32 %v520_v23  ;;  %v521_v25 = vmax.f32 %v511_v24, 1.0  ;;  %v1626_v28 = vpop.eup %1625  ;;  %v679_v33 = vmul.f32 %v1624_v26, %v644_v7  ;;  %v849_v24 = vld [vmem:[%s2016_s3] sm:$0xff] }
 0x197   : > { %v514_v27 = vpop.xlane.xlu1 %513  ;;  %v677_v36 = vmul.f32 %v1626_v28, %v634_v5  ;;  %1561 = vmatprep.subr.mxu0 %v849_v24 }
 0x198   : > { %1635 = vrsqrt.f32 %v521_v25  ;;  %v522_v29 = vmax.f32 %v514_v27, 1.0  ;;  %1562 = vmatpush3.msra.mxu0 %v849_v24 }
 0x199   : > { %v1628_v30 = vpop.eup %1627 }
 0x19a   : > { %v1630_v31 = vpop.eup %1629  ;;  %v680_v32 = vmul.f32 %v1628_v30, %v1538_v6  ;;  %1637 = vrsqrt.f32 %v522_v29 }
 0x19b   : > { %v678_v34 = vmul.f32 %v1630_v31, %v1535_v4 }
 0x19c   : > { %v686_v37 = vpack.c.bf16 %v680_v32, %v679_v33 }
 0x19d   : > { %v685_v38 = vpack.c.bf16 %v678_v34, %v677_v36 }
 0x19e   : > { %v1632_v39 = vpop.eup %1631 }
 0x19f   : > { %v681_v40 = vmul.f32 %v1632_v39, %v654_v9  ;;  %1545 = vmatprep.subr.bf16.mxu1 %v685_v38 }
 0x1a0   : > { %v1634_v42 = vpop.eup %1633  ;;  %1546 = vmatpush3.bf16.msra.mxu1 %v685_v38 }
 0x1a1   : > { %v682_v43 = vmul.f32 %v1634_v42, %v1541_v8  ;;  %1547 = vmatprep.subr.bf16.mxu1 %v686_v37 }
 0x1a2   : > { %v1636_v45 = vpop.eup %1635 }
 0x1a3   : > { %v687_v46 = vpack.c.bf16 %v682_v43, %v681_v40  ;;  %v683_v49 = vmul.f32 %v1636_v45, %v664_v11 }
 0x1a4   : > { %v1638_v47 = vpop.eup %1637  ;;  %1548 = vmatpush3.bf16.msra.mxu1 %v686_v37 }
 0x1a5   : > { %v684_v48 = vmul.f32 %v1638_v47, %v1544_v10  ;;  %1549 = vmatprep.subr.bf16.mxu1 %v687_v46 }
 0x1a7   : > { %v688_v50 = vpack.c.bf16 %v684_v48, %v683_v49 }
 0x1a8   : > { %1550 = vmatpush3.bf16.msra.mxu1 %v687_v46 }
 0x1a9   : > { %1551 = vmatprep.subr.bf16.mxu1 %v688_v50 }
 0x1ac   : > { %1552 = vmatpush3.bf16.msra.mxu1 %v688_v50 }
 0x1ad   : > { %1597 = vmatprep.subr.mxu1 %v849_v24 }
 0x1af   : > { %1554 = vmatmul.mubr.msk.bf16.vlgmr.msra.gmra.mrb[8].mxu1 %vm378_vm1, %v674_v44 }
 0x1b0   : > { %1557 = vmatprep.mubr.msk.bf16.mxu1 %vm378_vm1, %v675_v1  ;;  %1598 = vmatpush3.msra.mxu1 %v849_v24 }
 0x1b7   : > { %1558 = vmatmul.mubr.msk.bf16.gmra.mrb[12].mxu1 %vm378_vm1, %v676_v63 }
 0x282   : > { %v1555_v51 = vpop.f32.mrb[8].mxu1 }
 0x283   : > { %v768_v52 = vmul.f32 %v1624_v26, %v1555_v51  ;;  %v735_v53 = vpop.f32.mrb[9].mxu1 }
 0x284   : > { %v766_v54 = vmul.f32 %v1626_v28, %v735_v53  ;;  %v1556_v55 = vpop.f32.mrb[10].mxu1 }
 0x285   : > { %v769_v56 = vmul.f32 %v1628_v30, %v1556_v55  ;;  %v738_v58 = vpop.f32.mrb[11].mxu1  ;;  %v1872_v35 = vmax.f32 %v768_v52, 0.0 }
 0x286   : > { %v1874_v41 = vmax.f32 %v766_v54, 0.0  ;;  %v767_v44 = vmul.f32 %v1630_v31, %v738_v58 }
 0x287   : > { %v1876_v59 = vmax.f32 %v769_v56, 0.0  ;;  %v784_v0 = vmul.f32 %v1872_v35, %v1872_v35 }
 0x288   : > { %v1878_v60 = vmax.f32 %v767_v44, 0.0  ;;  %v782_v57 = vmul.f32 %v1874_v41, %v1874_v41  ;;  %v1435_v44 = vld [vmem:[%s2017_s4] ss:$0 sm:$0xff] }
 0x289   : > { %v785_v6 = vmul.f32 %v1876_v59, %v1876_v59  ;;  %v797_v12 = vsel %vm790_vm10, %v784_v0, 0.0 }
 0x28a   : > { %v1559_v61 = vpop.f32.mrb[12].mxu1  ;;  %v791_v62 = vsel %vm790_vm10, %v782_v57, 0.0  ;;  %v783_v63 = vmul.f32 %v1878_v60, %v1878_v60 }
 0x28b   : > { %v772_v1 = vmul.f32 %v1636_v45, %v1559_v61  ;;  %792 = vadd.xlane.f32.xlu0 %v791_v62  ;;  %v751_v2 = vpop.f32.mrb[13].mxu1  ;;  %v800_v15 = vsel %vm790_vm10, %v785_v6, 0.0  ;;  %v1444_v6 = vld [vmem:[%s2018_s5] ss:$0 sm:$0xff] }
 0x28c   : > { %v770_v3 = vmul.f32 %v1632_v39, %v751_v2  ;;  %v1560_v4 = vpop.f32.mrb[14].mxu1  ;;  %v794_v5 = vsel %vm790_vm10, %v783_v63, 0.0 }
 0x28d   : > { %v773_v7 = vmul.f32 %v1638_v47, %v1560_v4  ;;  %795 = vadd.xlane.f32.xlu1 %v794_v5  ;;  %v754_v8 = vpop.f32.mrb[15].mxu1  ;;  %v1890_v9 = vmax.f32 %v772_v1, 0.0 }
 0x28e   : > { %v1892_v10 = vmax.f32 %v770_v3, 0.0  ;;  %v771_v11 = vmul.f32 %v1634_v42, %v754_v8 }
 0x28f   : > { %798 = vadd.xlane.f32.xlu0 %v797_v12  ;;  %v1895_v13 = vmax.f32 %v773_v7, 0.0  ;;  %v788_v19 = vmul.f32 %v1890_v9, %v1890_v9 }
 0x290   : > { %v1897_v14 = vmax.f32 %v771_v11, 0.0  ;;  %v786_v16 = vmul.f32 %v1892_v10, %v1892_v10 }
 0x291   : > { %801 = vadd.xlane.f32.xlu1 %v800_v15  ;;  %v789_v21 = vmul.f32 %v1895_v13, %v1895_v13  ;;  %v809_v22 = vsel %vm790_vm10, %v788_v19, 0.0 }
 0x292   : > { %v803_v17 = vsel %vm790_vm10, %v786_v16, 0.0  ;;  %v787_v18 = vmul.f32 %v1897_v14, %v1897_v14 }
 0x293   : > { %804 = vadd.xlane.f32.xlu0 %v803_v17  ;;  %v812_v23 = vsel %vm790_vm10, %v789_v21, 0.0 }
 0x294   : > { %v806_v20 = vsel %vm790_vm10, %v787_v18, 0.0 }
 0x295   : > { %807 = vadd.xlane.f32.xlu1 %v806_v20 }
 0x297   : > { %810 = vadd.xlane.f32.xlu0 %v809_v22 }
 0x299   : > { %813 = vadd.xlane.f32.xlu1 %v812_v23 }
 0x318   : > { %v793_v25 = vpop.xlane.xlu0 %792 }
 0x319   : > { %v815_v26 = vmax.f32 %v793_v25, 1e-24 }
 0x31a   : > { %v796_v27 = vpop.xlane.xlu1 %795 }
 0x31b   : > { %1639 = vrsqrt.f32 %v815_v26  ;;  %v816_v28 = vmax.f32 %v796_v27, 1e-24 }
 0x31c   : > { %v799_v29 = vpop.xlane.xlu0 %798 }
 0x31d   : > { %1641 = vrsqrt.f32 %v816_v28  ;;  %v817_v30 = vmax.f32 %v799_v29, 1e-24 }
 0x31e   : > { %v802_v31 = vpop.xlane.xlu1 %801 }
 0x31f   : > { %1643 = vrsqrt.f32 %v817_v30  ;;  %v818_v32 = vmax.f32 %v802_v31, 1e-24 }
 0x320   : > { %v805_v33 = vpop.xlane.xlu0 %804 }
 0x321   : > { %1645 = vrsqrt.f32 %v818_v32  ;;  %v819_v34 = vmax.f32 %v805_v33, 1e-24 }
 0x322   : > { %v808_v36 = vpop.xlane.xlu1 %807 }
 0x323   : > { %1647 = vrsqrt.f32 %v819_v34  ;;  %v820_v37 = vmax.f32 %v808_v36, 1e-24 }
 0x324   : > { %v811_v38 = vpop.xlane.xlu0 %810 }
 0x325   : > { %v1640_v39 = vpop.eup %1639  ;;  %1649 = vrsqrt.f32 %v820_v37  ;;  %v821_v40 = vmax.f32 %v811_v38, 1e-24 }
 0x326   : > { %v814_v42 = vpop.xlane.xlu1 %813  ;;  %v831_v43 = vmul.f32 %v1640_v39, %v1874_v41 }
 0x327   : > { %v1642_v45 = vpop.eup %1641  ;;  %1651 = vrsqrt.f32 %v821_v40  ;;  %v822_v46 = vmax.f32 %v814_v42, 1e-24 }
 0x328   : > { %v832_v47 = vmul.f32 %v1642_v45, %v1878_v60  ;;  %841 = vst.msk [vmem:[%s840_s16] sm:$0xff] %vm790_vm10, %v831_v43  ;;  %1563 = vmatprep.mubr.msk.f32.mxu0 %vm790_vm10, %v831_v43 }
 0x329   : > { %v1644_v48 = vpop.eup %1643  ;;  %1653 = vrsqrt.f32 %v822_v46 }
 0x32a   : > { %842 = vst.msk [vmem:[%s840_s16 + $0x8] sm:$0xff] %vm790_vm10, %v832_v47  ;;  %1564 = vmatmul.mubr.msk.f32.vlgmr.msra.gmra.mrb[8].mxu0 %vm790_vm10, %v832_v47  ;;  %v833_v49 = vmul.f32 %v1644_v48, %v1872_v35  ;;  %v1108_v47 = vld [vmem:[%s2019_s6] sm:$0xff] (!%p1446_p5) }
 0x32b   : > { %v1646_v50 = vpop.eup %1645  ;;  %1575 = vmatprep.subr.mxu0 (!%p1446_p5), %v1108_v47  ;;  %1599 = vmatprep.subr.mxu1 (!%p1446_p5), %v1108_v47 }
 0x32c   : > { %843 = vst.msk [vmem:[%s840_s16 + $0x10] sm:$0xff] %vm790_vm10, %v833_v49  ;;  %1566 = vmatprep.mubr.msk.f32.mxu0 %vm790_vm10, %v833_v49  ;;  %v834_v51 = vmul.f32 %v1646_v50, %v1876_v59  ;;  %1576 = vmatpush3.msra.mxu0 (!%p1446_p5), %v1108_v47 }
 0x32d   : > { %v1648_v52 = vpop.eup %1647 }
 0x32e   : > { %844 = vst.msk [vmem:[%s840_s16 + $0x18] sm:$0xff] %vm790_vm10, %v834_v51  ;;  %1567 = vmatmul.mubr.msk.f32.gmra.mrb[10].mxu0 %vm790_vm10, %v834_v51  ;;  %v835_v53 = vmul.f32 %v1648_v52, %v1892_v10 }
 0x32f   : > { %v1650_v54 = vpop.eup %1649 }
 0x330   : > { %845 = vst.msk [vmem:[%s840_s16 + $0x20] sm:$0xff] %vm790_vm10, %v835_v53  ;;  %1569 = vmatprep.mubr.msk.f32.mxu0 %vm790_vm10, %v835_v53  ;;  %v836_v55 = vmul.f32 %v1650_v54, %v1897_v14 }
 0x331   : > { %v1652_v56 = vpop.eup %1651 }
 0x332   : > { %846 = vst.msk [vmem:[%s840_s16 + $0x28] sm:$0xff] %vm790_vm10, %v836_v55  ;;  %1570 = vmatmul.mubr.msk.f32.gmra.mrb[12].mxu0 %vm790_vm10, %v836_v55  ;;  %v837_v58 = vmul.f32 %v1652_v56, %v1890_v9 }
 0x333   : > { %v1654_v35 = vpop.eup %1653 }
 0x334   : > { %v838_v41 = vmul.f32 %v1654_v35, %v1895_v13  ;;  %847 = vst.msk [vmem:[%s840_s16 + $0x30] sm:$0xff] %vm790_vm10, %v837_v58  ;;  %1572 = vmatprep.mubr.msk.f32.mxu1 %vm790_vm10, %v837_v58 }
 0x336   : > { %848 = vst.msk [vmem:[%s840_s16 + $0x38] sm:$0xff] %vm790_vm10, %v838_v41  ;;  %1573 = vmatmul.mubr.msk.f32.vlgmr.msra.gmra.mrb[16].mxu1 %vm790_vm10, %v838_v41 }
 0x337   : > { %1600 = vmatpush3.msra.mxu1 (!%p1446_p5), %v1108_v47 }
 0x3fd   : > { %v1565_v59 = vpop.f32.mrb[8].mxu0 }
 0x3fe   : > { %v953_v60 = vadd.f32 %v1565_v59, %v1435_v44  ;;  %v947_v57 = vpop.f32.mrb[9].mxu0 }
 0x3ff   : > { %v948_v61 = vadd.f32 %v1435_v44, %v947_v57 }
 0x400   : > { %1655 = vtanh.f32 %v953_v60 }
 0x401   : > { %1657 = vtanh.f32 %v948_v61  ;;  %v1568_v62 = vpop.f32.mrb[10].mxu0  ;;  %v1054_v61 = vld [vmem:[#allocation2] sm:$0xff] (!%p1446_p5) }
 0x402   : > { %v963_v63 = vadd.f32 %v1568_v62, %v1435_v44  ;;  %v957_v0 = vpop.f32.mrb[11].mxu0 }
 0x403   : > { %v958_v1 = vadd.f32 %v1435_v44, %v957_v0  ;;  %v1055_v0 = vld [vmem:[#allocation2 + $0x8] sm:$0xff] (!%p1446_p5) }
 0x404   : > { %1659 = vtanh.f32 %v963_v63  ;;  %v1058_v63 = vld [vmem:[#allocation2 + $0x20] sm:$0xff] (!%p1446_p5) }
 0x405   : > { %1661 = vtanh.f32 %v958_v1  ;;  %v1571_v2 = vpop.f32.mrb[12].mxu0  ;;  %v1059_v1 = vld [vmem:[#allocation2 + $0x28] sm:$0xff] (!%p1446_p5) }
 0x406   : > { %v973_v3 = vadd.f32 %v1571_v2, %v1435_v44  ;;  %v967_v4 = vpop.f32.mrb[13].mxu0  ;;  %v1079_v2 = vld [vmem:[#allocation2 + $0x40] sm:$0xff] (!%p1446_p5) }
 0x407   : > { %v968_v5 = vadd.f32 %v1435_v44, %v967_v4  ;;  %v1060_v4 = vld [vmem:[#allocation2 + $0x30] sm:$0xff] (!%p1446_p5) }
 0x408   : > { %1663 = vtanh.f32 %v973_v3  ;;  %v1056_v3 = vld [vmem:[#allocation2 + $0x10] sm:$0xff] (!%p1446_p5) }
 0x409   : > { %1665 = vtanh.f32 %v968_v5  ;;  %v1574_v7 = vpop.f32.mrb[16].mxu1  ;;  %v1083_v5 = vld [vmem:[#allocation2 + $0x60] sm:$0xff] (!%p1446_p5) }
 0x40a   : > { %v1656_v8 = vpop.eup %1655  ;;  %v983_v9 = vadd.f32 %v1574_v7, %v1435_v44  ;;  %v977_v10 = vpop.f32.mrb[17].mxu1  ;;  %v1084_v7 = vld [vmem:[#allocation2 + $0x68] sm:$0xff] (!%p1446_p5) }
 0x40b   : > { %v1658_v11 = vpop.eup %1657  ;;  %v1002_v12 = vmul.f32 %v1656_v8, %v1444_v6  ;;  %v978_v13 = vadd.f32 %v1435_v44, %v977_v10 }
 0x40c   : > { %v1001_v14 = vmul.f32 %v1658_v11, %v1444_v6  ;;  %1667 = vtanh.f32 %v983_v9 }
 0x40d   : > { %1669 = vtanh.f32 %v978_v13  ;;  %v1085_v13 = vld [vmem:[#allocation2 + $0x70] sm:$0xff] (!%p1446_p5) }
 0x40e   : > { %v1660_v15 = vpop.eup %1659  ;;  %v1009_v16 = vadd.f32 %v1002_v12, %v1001_v14  ;;  %v1081_v12 = vld [vmem:[#allocation2 + $0x50] sm:$0xff] (!%p1446_p5) }
 0x40f   : > { %v1662_v17 = vpop.eup %1661  ;;  %v1004_v20 = vmul.f32 %v1660_v15, %v1444_v6 }
 0x410   : > { %v1003_v18 = vmul.f32 %v1662_v17, %v1444_v6  ;;  %v1057_v17 = vld [vmem:[#allocation2 + $0x18] sm:$0xff] (!%p1446_p5) }
 0x412   : > { %v1664_v19 = vpop.eup %1663  ;;  %v1010_v21 = vadd.f32 %v1009_v16, %v1003_v18 }
 0x413   : > { %v1666_v22 = vpop.eup %1665  ;;  %v1006_v26 = vmul.f32 %v1664_v19, %v1444_v6 }
 0x414   : > { %v1005_v23 = vmul.f32 %v1666_v22, %v1444_v6  ;;  %v1011_v24 = vadd.f32 %v1010_v21, %v1004_v20  ;;  %v1082_v22 = vld [vmem:[#allocation2 + $0x58] sm:$0xff] (!%p1446_p5) }
 0x416   : > { %v1668_v25 = vpop.eup %1667  ;;  %v1012_v27 = vadd.f32 %v1011_v24, %v1005_v23  ;;  %v1061_v23 = vld [vmem:[#allocation2 + $0x38] sm:$0xff] (!%p1446_p5) }
 0x417   : > { %v1670_v28 = vpop.eup %1669  ;;  %v1008_v31 = vmul.f32 %v1668_v25, %v1444_v6  ;;  %v1086_v24 = vld [vmem:[#allocation2 + $0x78] sm:$0xff] (!%p1446_p5) }
 0x418   : > { %v1007_v29 = vmul.f32 %v1670_v28, %v1444_v6  ;;  %v1013_v30 = vadd.f32 %v1012_v27, %v1006_v26  ;;  %v1080_v6 = vld [vmem:[#allocation2 + $0x48] sm:$0xff] (!%p1446_p5) }
 0x41a   : > { %v1014_v32 = vadd.f32 %v1013_v30, %v1007_v29 }
 0x41c   : > { %v1015_v33 = vadd.f32 %v1014_v32, %v1008_v31 }
 0x41e   : > { %1016 = vadd.xlane.f32.xlu0 %v1015_v33 }
 0x4ab   : > { %v1017_v34 = vpop.xlane.xlu0 %1016 }
 0x4ac   : > { %v1018_v36 = vrot.slane %v1017_v34, 4 }
 0x4ae   : > { %v1019_v37 = vadd.f32 %v1018_v36, %v1017_v34 }
 0x4b0   : > { %v1020_v38 = vrot.slane %v1019_v37, 2 }
 0x4b2   : > { %v1021_v39 = vadd.f32 %v1020_v38, %v1019_v37 }
 0x4b4   : > { %v1022_v40 = vrot.slane %v1021_v39, 1 }
 0x4b6   : > { %v1023_v42 = vadd.f32 %v1022_v40, %v1021_v39  ;;  %v1447_v40 = vld [vmem:[%s2020_s7] ss:$0 sm:$0xff] (!%p1446_p5) }
 0x4b8   : > { %1601 = vpush %v1023_v42 }
 0x4e7   : > { %1033 = sbr.rel (%p1446_p5) target bundleno = 1914 (0x77a), region = 56 }
 0x4e9   : > { %s1602_s21 = spop %1601 }
 0x4ea   : > { %v1025_v43 = vstv %s1602_s21 }
 0x4eb   : > { %v1026_v45 = vmul.f32 0.015625, %v1025_v43 }
 0x4ed   : > { %1462 = vst.msk [vmem:[%s1460_s22 - $0x1] sm:$0x1] %vm1028_vm11, %v1026_v45 }
 0x4f4   : > { %v1034_v46 = vld [vmem:[#allocation3] sm:$0x3] }
 0x4f5   : > { %v1036_v48 = vrot.slane %v1034_v46, 1 }
 0x4f7   : > { %v1038_v49 = vmax.f32 %v1034_v46, %v1036_v48 }
 0x4f9   : > { %v1039_v50 = vsub.f32 %v1034_v46, %v1038_v49  ;;  %v1043_v51 = vrot.slane %v1038_v49, 7 }
 0x4fb   : > { %v1040_v52 = vmul.f32 1.442695, %v1039_v50  ;;  %v1045_v53 = vsub.f32 %v1034_v46, %v1043_v51 }
 0x4fd   : > { %v1046_v54 = vmul.f32 1.442695, %v1045_v53  ;;  %1671 = vpow2.f32 %v1040_v52 }
 0x4ff   : > { %1673 = vpow2.f32 %v1046_v54 }
 0x507   : > { %v1672_v55 = vpop.eup %1671 }
 0x509   : > { %v1674_v56 = vpop.eup %1673 }
 0x50a   : > { %v1049_v58 = vrot.slane %v1674_v56, 1 }
 0x50c   : > { %v1051_v35 = vadd.f32 %v1672_v55, %v1049_v58 }
 0x50e   : > { %1675 = vrcp.f32 %v1051_v35 }
 0x518   : > { %v1676_v41 = vpop.eup %1675 }
 0x519   : > { %v1053_v44 = vmul.f32 %v1676_v41, %v1672_v55  ;;  %v1075_v59 = vrot.slane %v1676_v41, 7 }
 0x51b   : > { %1603 = vpush %v1053_v44  ;;  %v1077_v60 = vmul.f32 %v1674_v56, %v1075_v59 }
 0x51d   : > { %v1088_v57 = vrot.slane %v1077_v60, 1 }
 0x51f   : > { %1605 = vpush %v1088_v57 }
 0x54c   : > { %s1604_s28 = spop %1603 }
 0x54d   : > { %v1064_v62 = vstv %s1604_s28 }
 0x54e   : > { %v1066_v8 = vmul.f32 %v1064_v62, %v1054_v61  ;;  %v1070_v9 = vmul.f32 %v1064_v62, %v1058_v63  ;;  %v1067_v10 = vmul.f32 %v1064_v62, %v1055_v0  ;;  %v1071_v11 = vmul.f32 %v1064_v62, %v1059_v1 }
 0x54f   : > { %v1068_v15 = vmul.f32 %v1064_v62, %v1056_v3  ;;  %v1072_v16 = vmul.f32 %v1064_v62, %v1060_v4  ;;  %v1069_v31 = vmul.f32 %v1064_v62, %v1057_v17  ;;  %v1073_v33 = vmul.f32 %v1064_v62, %v1061_v23 }
 0x550   : > { %s1606_s25 = spop %1605 }
 0x551   : > { %v1090_v14 = vstv %s1606_s25 }
 0x552   : > { %v1092_v18 = vmul.f32 %v1090_v14, %v1079_v2  ;;  %v1096_v19 = vmul.f32 %v1090_v14, %v1083_v5  ;;  %v1093_v20 = vmul.f32 %v1090_v14, %v1080_v6  ;;  %v1097_v21 = vmul.f32 %v1090_v14, %v1084_v7 }
 0x553   : > { %v1094_v25 = vmul.f32 %v1090_v14, %v1081_v12  ;;  %v1098_v26 = vmul.f32 %v1090_v14, %v1085_v13  ;;  %v1095_v32 = vmul.f32 %v1090_v14, %v1082_v22  ;;  %v1099_v34 = vmul.f32 %v1090_v14, %v1086_v24 }
 0x554   : > { %v1100_v27 = vadd.f32 %v1092_v18, %v1066_v8  ;;  %v1104_v28 = vadd.f32 %v1096_v19, %v1070_v9  ;;  %v1101_v29 = vadd.f32 %v1093_v20, %v1067_v10  ;;  %v1105_v30 = vadd.f32 %v1097_v21, %v1071_v11 }
 0x555   : > { %v1102_v36 = vadd.f32 %v1094_v25, %v1068_v15  ;;  %v1106_v37 = vadd.f32 %v1098_v26, %v1072_v16  ;;  %v1103_v38 = vadd.f32 %v1095_v32, %v1069_v31  ;;  %v1107_v39 = vadd.f32 %v1099_v34, %v1073_v33 }
 0x556   : > { %1577 = vmatprep.mubr.msk.f32.mxu0 %vm790_vm10, %v1100_v27  ;;  %1583 = vmatprep.mubr.msk.f32.mxu1 %vm790_vm10, %v1104_v28 }
 0x557   : > { %1578 = vmatmul.mubr.msk.f32.vlgmr.msra.gmra.mrb[0].mxu0 %vm790_vm10, %v1101_v29  ;;  %1584 = vmatmul.mubr.msk.f32.vlgmr.msra.gmra.mrb[0].mxu1 %vm790_vm10, %v1105_v30 }
 0x558   : > { %1580 = vmatprep.mubr.msk.f32.mxu0 %vm790_vm10, %v1102_v36  ;;  %1586 = vmatprep.mubr.msk.f32.mxu1 %vm790_vm10, %v1106_v37 }
 0x55b   : > { %1581 = vmatmul.mubr.msk.f32.gmra.mrb[2].mxu0 %vm790_vm10, %v1103_v38  ;;  %1587 = vmatmul.mubr.msk.f32.gmra.mrb[2].mxu1 %vm790_vm10, %v1107_v39 }
 0x62a   : > { %v1579_v42 = vpop.f32.mrb[0].mxu0  ;;  %v1585_v43 = vpop.f32.mrb[0].mxu1 }
 0x62b   : > { %v1212_v45 = vadd.f32 %v1579_v42, %v1447_v40  ;;  %v1232_v46 = vadd.f32 %v1585_v43, %v1447_v40  ;;  %v1206_v47 = vpop.f32.mrb[1].mxu0  ;;  %v1226_v48 = vpop.f32.mrb[1].mxu1 }
 0x62c   : > { %v1207_v49 = vadd.f32 %v1447_v40, %v1206_v47  ;;  %v1227_v52 = vadd.f32 %v1447_v40, %v1226_v48 }
 0x62d   : > { %v1246_v50 = vadd.f32 1e-08, %v1212_v45  ;;  %v1250_v51 = vadd.f32 1e-08, %v1232_v46 }
 0x62e   : > { %v1582_v53 = vpop.f32.mrb[2].mxu0  ;;  %v1588_v54 = vpop.f32.mrb[2].mxu1  ;;  %v1245_v55 = vadd.f32 1e-08, %v1207_v49  ;;  %v1249_v57 = vadd.f32 1e-08, %v1227_v52 }
 0x62f   : > { %v1222_v56 = vadd.f32 %v1582_v53, %v1447_v40  ;;  %v1216_v58 = vpop.f32.mrb[3].mxu0  ;;  %v1236_v35 = vpop.f32.mrb[3].mxu1  ;;  %v1269_v41 = vsel %vm1253_vm12, %v1250_v51, -inf  ;;  %v1257_v44 = vsel %vm1253_vm12, %v1246_v50, -inf  ;;  %v1242_v61 = vadd.f32 %v1588_v54, %v1447_v40 }
 0x630   : > { %v1217_v59 = vadd.f32 %v1447_v40, %v1216_v58  ;;  %1270 = vmax.xlane.f32.xlu1 %v1269_v41  ;;  %1258 = vmax.xlane.f32.xlu0 %v1257_v44  ;;  %v1237_v63 = vadd.f32 %v1447_v40, %v1236_v35  ;;  %v1254_v1 = vsel %vm1253_vm12, %v1245_v55, -inf  ;;  %v1266_v5 = vsel %vm1253_vm12, %v1249_v57, -inf }
 0x631   : > { %v1248_v60 = vadd.f32 1e-08, %v1222_v56  ;;  %v1252_v2 = vadd.f32 1e-08, %v1242_v61 }
 0x632   : > { %v1247_v62 = vadd.f32 1e-08, %v1217_v59  ;;  %v1251_v3 = vadd.f32 1e-08, %v1237_v63 }
 0x633   : > { %v1263_v0 = vsel %vm1253_vm12, %v1248_v60, -inf  ;;  %v1275_v6 = vsel %vm1253_vm12, %v1252_v2, -inf }
 0x634   : > { %1264 = vmax.xlane.f32.xlu1 %v1263_v0  ;;  %1255 = vmax.xlane.f32.xlu0 %v1254_v1  ;;  %v1260_v4 = vsel %vm1253_vm12, %v1247_v62, -inf  ;;  %v1272_v7 = vsel %vm1253_vm12, %v1251_v3, -inf }
 0x638   : > { %1261 = vmax.xlane.f32.xlu1 %v1260_v4  ;;  %1267 = vmax.xlane.f32.xlu0 %v1266_v5 }
 0x63c   : > { %1276 = vmax.xlane.f32.xlu1 %v1275_v6  ;;  %1273 = vmax.xlane.f32.xlu0 %v1272_v7 }
 0x6bd   : > { %v1271_v8 = vpop.xlane.xlu1 %1270  ;;  %v1259_v9 = vpop.xlane.xlu0 %1258 }
 0x6be   : > { %v1283_v10 = vsub.f32 %v1250_v51, %v1271_v8  ;;  %v1279_v11 = vsub.f32 %v1246_v50, %v1259_v9 }
 0x6c0   : > { %v1288_v12 = vmul.f32 1.442695, %v1279_v11  ;;  %v1296_v13 = vmul.f32 1.442695, %v1283_v10 }
 0x6c1   : > { %v1265_v14 = vpop.xlane.xlu1 %1264  ;;  %v1256_v15 = vpop.xlane.xlu0 %1255 }
 0x6c2   : > { %v1281_v16 = vsub.f32 %v1248_v60, %v1265_v14  ;;  %v1278_v17 = vsub.f32 %v1245_v55, %v1256_v15  ;;  %1677 = vpow2.f32 %v1288_v12 }
 0x6c3   : > { %1679 = vpow2.f32 %v1296_v13 }
 0x6c4   : > { %v1286_v18 = vmul.f32 1.442695, %v1278_v17  ;;  %v1292_v19 = vmul.f32 1.442695, %v1281_v16 }
 0x6c5   : > { %v1262_v20 = vpop.xlane.xlu1 %1261  ;;  %v1268_v21 = vpop.xlane.xlu0 %1267 }
 0x6c6   : > { %v1280_v22 = vsub.f32 %v1247_v62, %v1262_v20  ;;  %v1282_v23 = vsub.f32 %v1249_v57, %v1268_v21  ;;  %1681 = vpow2.f32 %v1286_v18 }
 0x6c7   : > { %1683 = vpow2.f32 %v1292_v19 }
 0x6c8   : > { %v1294_v24 = vmul.f32 1.442695, %v1282_v23  ;;  %v1290_v25 = vmul.f32 1.442695, %v1280_v22 }
 0x6c9   : > { %v1277_v26 = vpop.xlane.xlu1 %1276  ;;  %v1274_v27 = vpop.xlane.xlu0 %1273 }
 0x6ca   : > { %v1285_v28 = vsub.f32 %v1252_v2, %v1277_v26  ;;  %v1284_v29 = vsub.f32 %v1251_v3, %v1274_v27  ;;  %1685 = vpow2.f32 %v1294_v24 }
 0x6cb   : > { %1687 = vpow2.f32 %v1290_v25 }
 0x6cc   : > { %v1300_v30 = vmul.f32 1.442695, %v1285_v28  ;;  %v1678_v31 = vpop.eup %1677  ;;  %v1298_v32 = vmul.f32 1.442695, %v1284_v29 }
 0x6cd   : > { %v1305_v33 = vsel %vm1253_vm12, %v1678_v31, 0.0  ;;  %v1680_v34 = vpop.eup %1679 }
 0x6ce   : > { %1689 = vpow2.f32 %v1300_v30  ;;  %1306 = vadd.xlane.f32.xlu1 %v1305_v33  ;;  %v1317_v37 = vsel %vm1253_vm12, %v1680_v34, 0.0 }
 0x6cf   : > { %1691 = vpow2.f32 %v1298_v32 }
 0x6d0   : > { %v1682_v36 = vpop.eup %1681 }
 0x6d1   : > { %v1302_v38 = vsel %vm1253_vm12, %v1682_v36, 0.0  ;;  %v1684_v39 = vpop.eup %1683 }
 0x6d2   : > { %1318 = vadd.xlane.f32.xlu1 %v1317_v37  ;;  %1303 = vadd.xlane.f32.xlu0 %v1302_v38  ;;  %v1311_v42 = vsel %vm1253_vm12, %v1684_v39, 0.0 }
 0x6d4   : > { %v1686_v40 = vpop.eup %1685 }
 0x6d5   : > { %v1314_v43 = vsel %vm1253_vm12, %v1686_v40, 0.0  ;;  %v1688_v45 = vpop.eup %1687 }
 0x6d6   : > { %1312 = vadd.xlane.f32.xlu1 %v1311_v42  ;;  %1315 = vadd.xlane.f32.xlu0 %v1314_v43  ;;  %v1308_v48 = vsel %vm1253_vm12, %v1688_v45, 0.0 }
 0x6d8   : > { %v1690_v46 = vpop.eup %1689 }
 0x6d9   : > { %v1323_v47 = vsel %vm1253_vm12, %v1690_v46, 0.0  ;;  %v1692_v49 = vpop.eup %1691 }
 0x6da   : > { %1324 = vadd.xlane.f32.xlu1 %v1323_v47  ;;  %1309 = vadd.xlane.f32.xlu0 %v1308_v48  ;;  %v1320_v50 = vsel %vm1253_vm12, %v1692_v49, 0.0 }
 0x6de   : > { %1321 = vadd.xlane.f32.xlu0 %v1320_v50 }
 0x75b   : > { %v1307_v51 = vpop.xlane.xlu1 %1306 }
 0x75c   : > { %1693 = vrcp.f32 %v1307_v51 }
 0x75f   : > { %v1319_v52 = vpop.xlane.xlu1 %1318  ;;  %v1304_v53 = vpop.xlane.xlu0 %1303 }
 0x760   : > { %1695 = vrcp.f32 %v1319_v52 }
 0x761   : > { %1697 = vrcp.f32 %v1304_v53 }
 0x763   : > { %v1313_v54 = vpop.xlane.xlu1 %1312  ;;  %v1316_v55 = vpop.xlane.xlu0 %1315 }
 0x764   : > { %1699 = vrcp.f32 %v1313_v54 }
 0x765   : > { %1701 = vrcp.f32 %v1316_v55 }
 0x766   : > { %v1694_v56 = vpop.eup %1693 }
 0x767   : > { %v1335_v58 = vmul.f32 %v1694_v56, %v1678_v31  ;;  %v1325_v35 = vpop.xlane.xlu1 %1324  ;;  %v1310_v41 = vpop.xlane.xlu0 %1309 }
 0x768   : > { %1703 = vrcp.f32 %v1325_v35 }
 0x769   : > { %1343 = vst.msk [vmem:[%s2021_s8 + $0x8] sm:$0xff] %vm1253_vm12, %v1335_v58  ;;  %1705 = vrcp.f32 %v1310_v41 }
 0x76a   : > { %v1696_v44 = vpop.eup %1695 }
 0x76b   : > { %v1698_v59 = vpop.eup %1697  ;;  %v1339_v60 = vmul.f32 %v1696_v44, %v1680_v34  ;;  %v1322_v57 = vpop.xlane.xlu0 %1321 }
 0x76c   : > { %v1334_v61 = vmul.f32 %v1698_v59, %v1682_v36  ;;  %1707 = vrcp.f32 %v1322_v57 }
 0x76d   : > { %1347 = vst.msk [vmem:[%s2021_s8 + $0x28] sm:$0xff] %vm1253_vm12, %v1339_v60 }
 0x76e   : > { %v1700_v62 = vpop.eup %1699  ;;  %1342 = vst.msk [vmem:[%s2021_s8] sm:$0xff] %vm1253_vm12, %v1334_v61 }
 0x76f   : > { %v1702_v63 = vpop.eup %1701  ;;  %v1337_v0 = vmul.f32 %v1700_v62, %v1684_v39 }
 0x770   : > { %v1338_v1 = vmul.f32 %v1702_v63, %v1686_v40 }
 0x771   : > { %1345 = vst.msk [vmem:[%s2021_s8 + $0x18] sm:$0xff] %vm1253_vm12, %v1337_v0 }
 0x772   : > { %v1704_v2 = vpop.eup %1703  ;;  %1346 = vst.msk [vmem:[%s2021_s8 + $0x20] sm:$0xff] %vm1253_vm12, %v1338_v1 }
 0x773   : > { %v1706_v3 = vpop.eup %1705  ;;  %v1341_v4 = vmul.f32 %v1704_v2, %v1690_v46 }
 0x774   : > { %v1336_v5 = vmul.f32 %v1706_v3, %v1688_v45 }
 0x775   : > { %1349 = vst.msk [vmem:[%s2021_s8 + $0x38] sm:$0xff] %vm1253_vm12, %v1341_v4 }
 0x776   : > { %v1708_v6 = vpop.eup %1707  ;;  %1344 = vst.msk [vmem:[%s2021_s8 + $0x10] sm:$0xff] %vm1253_vm12, %v1336_v5 }
 0x777   : > { %v1340_v7 = vmul.f32 %v1708_v6, %v1692_v49 }
 0x779   : > { %1348 = vst.msk [vmem:[%s2021_s8 + $0x30] sm:$0xff] %vm1253_vm12, %v1340_v7 }
 0x77a PF: > { %s18_s27 = sadd.s32 1, %s1715_s27  }
 0x77b   : > { %p15_p6 = scmp.ge.s32.totalorder %s18_s27, 4  }
 0x77d   :  { %17 = sbr.rel (!%p15_p6) target bundleno = 1 (0x1), region = 89 }

</bundles_post_ra>
